<compile_context>
chip_gen: v5e
topology: v5e:2x2
jax: 0.10.0
libtpu: 0.0.40
codegen_flags: <defaults>
</compile_context>

<pallas_src>
import jax
import jax.numpy as jnp
from jax import lax
from jax.experimental import pallas as pl
from jax.experimental.pallas import tpu as pltpu


def _round_up(v, m):
    return ((v + m - 1) // m) * m


def _padded_bytes(rows, cols, itemsize):
    # Physical VMEM footprint of a 2-D buffer: minor dim padded to 128 lanes,
    # second-minor dim padded to 8 sublanes.
    return _round_up(max(rows, 1), 8) * _round_up(max(cols, 1), 128) * itemsize


def _sort_project_kernel(x_ref, w_ref, ct_ref, o_ref):
    # Shapes:
    #   x_ref : (TN, in_dim)      streamed row tile of activations
    #   w_ref : (out_dim, in_dim) resident projection weight (PyTorch layout)
    #   ct_ref: (out_dim, TN)     streamed column tile of transposed collapse C^T
    #   o_ref : (1, TN)           lane-dense output row tile
    # p^T = W @ x^T, contraction over in_dim, no transposes materialized:
    pt = lax.dot_general(
        w_ref[...],
        x_ref[...],
        dimension_numbers=(((1,), (1,)), ((), ())),
        preferred_element_type=jnp.float32,
    )  # (out_dim, TN), f32 MXU accumulation
    # Fully lane-packed elementwise multiply, sublane reduction; result is already
    # the lane-dense (1, TN) output row -> direct unmasked store on full tiles.
    prod = pt * ct_ref[...].astype(jnp.float32)
    o_ref[...] = jnp.sum(prod, axis=0, keepdims=True).astype(o_ref.dtype)


def sort_project(x, w, c_t, *, row_tile=4096, stream_dtype=None):
    """
    SortProject forward:  out[i] = sum_j (x @ W.T)[i, j] * C[i, j]

    x   : (num_elements, in_dim)   activations
    w   : (out_dim, in_dim)        Linear weight, PyTorch layout (NOT transposed)
    c_t : (out_dim, num_elements)  lin_collapse stored feature-major (i.e. C.T).
                                   Keep the parameter in this layout; do not
                                   transpose a (num_elements, out_dim) array per
                                   call (extra HBM pass over the largest input).
    row_tile     : max rows per grid step (rounded to a multiple of 128).
    stream_dtype : optional narrower streaming dtype (e.g. jnp.bfloat16);
                   accumulation and the epilogue stay in f32.
    returns: (num_elements,) float32
    """
    n, in_dim = x.shape
    out_dim = w.shape[0]
    assert w.shape == (out_dim, in_dim)
    assert c_t.shape == (out_dim, n)

    if stream_dtype is not None:
        x = x.astype(stream_dtype)
        w = w.astype(stream_dtype)
        c_t = c_t.astype(stream_dtype)
    itemsize = jnp.dtype(x.dtype).itemsize

    # Row tile: multiple of 128 (lane-dense output, sublane-aligned inputs), large
    # enough to amortize per-grid-step overhead, no larger than the 128-rounded n.
    tn = _round_up(min(row_tile, _round_up(n, 128)), 128)
    # Keep >= 2 grid steps when the problem allows it so the "parallel" row axis
    # can shard across both TensorCores on v7x (free elsewhere).
    if n > 128:
        tn = min(tn, _round_up(pl.cdiv(n, 2), 128))

    # Padding-aware VMEM budget; shrink the tile if it would exceed a v7x-safe cap.
    vmem_cap = 48 << 20

    def _vmem_estimate(t):
        return (
            2 * _padded_bytes(t, in_dim, itemsize)            # x tiles (double-buffered)
            + 2 * _padded_bytes(out_dim, t, itemsize)         # c_t tiles (double-buffered)
            + 2 * _padded_bytes(out_dim, in_dim, itemsize)    # weight (2x for safety)
            + 2 * _padded_bytes(1, t, 4)                      # output tiles
            + 2 * _padded_bytes(out_dim, t, 4)                # p^T intermediate + slack
        )

    while tn > 128 and _vmem_estimate(tn) > vmem_cap:
        tn = _round_up(tn // 2, 128)
    vmem_bytes = min(_vmem_estimate(tn) + (4 << 20), vmem_cap)

    grid = (pl.cdiv(n, tn),)

    out = pl.pallas_call(
        _sort_project_kernel,
        out_shape=jax.ShapeDtypeStruct((1, n), jnp.float32),
        grid=grid,
        in_specs=[
            pl.BlockSpec((tn, in_dim), lambda i: (i, 0)),       # stream x row tiles
            pl.BlockSpec((out_dim, in_dim), lambda i: (0, 0)),  # weight resident
            pl.BlockSpec((out_dim, tn), lambda i: (0, i)),      # stream c_t col tiles
        ],
        out_specs=pl.BlockSpec((1, tn), lambda i: (0, i)),      # lane-dense output row
        compiler_params=pltpu.CompilerParams(
            dimension_semantics=("parallel",),
            vmem_limit_bytes=vmem_bytes,
        ),
    )(x, w, c_t)

    return out[0]


def init_params(key, in_dim, out_dim, num_elements):
    """Deterministic init mirroring the PyTorch __init__ (collapse stored transposed)."""
    k_w, k_c = jax.random.split(key)
    # xavier_normal_ for Linear weight (out_dim, in_dim): std = sqrt(2/(fan_in+fan_out))
    std = (2.0 / (in_dim + out_dim)) ** 0.5
    w = jax.random.normal(k_w, (out_dim, in_dim), dtype=jnp.float32) * std
    # normal_ (mean=0, std=1) for lin_collapse, stored feature-major: (out_dim, n)
    c_t = jax.random.normal(k_c, (out_dim, num_elements), dtype=jnp.float32)
    return w, c_t


if __name__ == "__main__":
    # Shapes consistent with the module's intended use.
    in_dim, out_dim, num_elements = 16, 32, 8

    key = jax.random.PRNGKey(0)
    k_x, k_p = jax.random.split(key)
    x = jax.random.normal(k_x, (num_elements, in_dim), dtype=jnp.float32)
    w, c_t = init_params(k_p, in_dim, out_dim, num_elements)

    out = jax.block_until_ready(sort_project(x, w, c_t))

    # Reference in plain JAX (same semantics as the PyTorch forward; C = c_t.T).
    ref = jnp.sum((x @ w.T) * c_t.T, axis=1)
    assert out.shape == (num_elements,)
    assert jnp.allclose(out, ref, atol=1e-5, rtol=1e-5)

    # Larger, non-128-multiple shape: exercises the ragged boundary block and the
    # >=2-grid-step (megacore) path, with no wrapper-side padding copies.
    n2, in2, out2 = 1000, 64, 96
    k1, k2 = jax.random.split(jax.random.PRNGKey(1))
    x2 = jax.random.normal(k1, (n2, in2), dtype=jnp.float32)
    w2, c2_t = init_params(k2, in2, out2, n2)
    out2_v = jax.block_until_ready(sort_project(x2, w2, c2_t))
    ref2 = jnp.sum((x2 @ w2.T) * c2_t.T, axis=1)
    assert out2_v.shape == (n2,)
    assert jnp.allclose(out2_v, ref2, atol=1e-4, rtol=1e-4)

    print("KERNEL_OK")
</pallas_src>

<mosaic_0001>
module attributes {stable_mosaic.version = 11 : i64} {
  func.func @_sort_project_kernel(%arg0: i32, %arg1: memref<128x16xf32, #tpu.memory_space<vmem>>, %arg2: memref<32x16xf32, #tpu.memory_space<vmem>>, %arg3: memref<32x128xf32, #tpu.memory_space<vmem>>, %arg4: memref<1x128xf32, #tpu.memory_space<vmem>>) attributes {dimension_semantics = [#tpu.dimension_semantics<parallel>], iteration_bounds = array<i64: 1>, scalar_prefetch = 0 : i64, scratch_operands = 0 : i64, tpu.core_type = #tpu.core_type<tc>, window_params = [{transform_indices = @transform_0, window_bounds = array<i64: 128, 16>}, {pipeline_mode = #tpu.pipeline_mode<synchronous>, transform_indices = @transform_1, window_bounds = array<i64: 32, 16>}, {transform_indices = @transform_2, window_bounds = array<i64: 32, 128>}, {transform_indices = @transform_3, window_bounds = array<i64: 1, 128>}]} {
    %c0 = arith.constant 0 : index
    %c0_0 = arith.constant 0 : index
    %0 = vector.load %arg2[%c0, %c0_0] : memref<32x16xf32, #tpu.memory_space<vmem>>, vector<32x16xf32>
    %c0_1 = arith.constant 0 : index
    %c0_2 = arith.constant 0 : index
    %1 = vector.load %arg1[%c0_1, %c0_2] : memref<128x16xf32, #tpu.memory_space<vmem>>, vector<128x16xf32>
    %cst = arith.constant dense<0.000000e+00> : vector<32x128xf32>
    %2 = tpu.matmul %0, %1, %cst {dimension_numbers = #tpu.dot_dimension_numbers<[1], [1], [0], [0], [0, 0, 1, 0], [], []>} : vector<32x16xf32>, vector<128x16xf32>, vector<32x128xf32> -> vector<32x128xf32>
    %c0_3 = arith.constant 0 : index
    %c0_4 = arith.constant 0 : index
    %3 = vector.load %arg3[%c0_3, %c0_4] : memref<32x128xf32, #tpu.memory_space<vmem>>, vector<32x128xf32>
    %4 = arith.mulf %2, %3 : vector<32x128xf32>
    %cst_5 = arith.constant dense<0.000000e+00> : vector<128xf32>
    %5 = vector.multi_reduction <add>, %4, %cst_5 [0] : vector<32x128xf32> to vector<128xf32>
    %6 = vector.shape_cast %5 : vector<128xf32> to vector<1x128xf32>
    %c0_6 = arith.constant 0 : index
    %c0_7 = arith.constant 0 : index
    %7 = vector.load %arg4[%c0_6, %c0_7] : memref<1x128xf32, #tpu.memory_space<vmem>>, vector<1x128xf32>
    tpu.vector_store %arg4[%c0_6, %c0_7], %6 {strides = array<i32>} : memref<1x128xf32, #tpu.memory_space<vmem>>, vector<1x128xf32>,
    return
  }
  func.func @transform_0(%arg0: i32) -> (i32, i32) {
    %c0_i32 = arith.constant 0 : i32
    %c0_i32_0 = arith.constant 0 : i32
    return %arg0, %c0_i32 : i32, i32
  }
  func.func @transform_1(%arg0: i32) -> (i32, i32) {
    %c0_i32 = arith.constant 0 : i32
    %c0_i32_0 = arith.constant 0 : i32
    %c0_i32_1 = arith.constant 0 : i32
    return %c0_i32, %c0_i32_0 : i32, i32
  }
  func.func @transform_2(%arg0: i32) -> (i32, i32) {
    %c0_i32 = arith.constant 0 : i32
    %c0_i32_0 = arith.constant 0 : i32
    return %c0_i32, %arg0 : i32, i32
  }
  func.func @transform_3(%arg0: i32) -> (i32, i32) {
    %c0_i32 = arith.constant 0 : i32
    %c0_i32_0 = arith.constant 0 : i32
    return %c0_i32, %arg0 : i32, i32
  }
}

</mosaic_0001>

<bundles_post_ra>
// kernel: tpu_custom_call.1
= control target key start
LH: loop header
LB: loop body
LE: loop exit
PB: predicated region body
PF: predicated region fallthrough
CT: control target
= control target key end

     0   :  { %vm35_vm0 = vcmask 130048   ;;  %s418_s0 = inlined_call_operand.vmem [shape: f32[8,16], index: 0, kind: input, shape index: {}]   ;;  %s419_s1 = inlined_call_operand.vmem [shape: f32[32,16], index: 1, kind: input, shape index: {}]   ;;  %s420_s2 = inlined_call_operand.vmem [shape: f32[32,8], index: 2, kind: input, shape index: {}]   ;;  %s421_s3 = inlined_call_operand.hbm [shape: f32[1,8], index: 3, kind: output, shape index: {}]  }
   0x1   :  { %v34_v0 = vld [vmem:[%s418_s0 + $0x78] sm:$0xff]  ;;  %v33_v1 = vld [vmem:[%s418_s0 + $0x70] sm:$0xff] }
   0x2   :  { %180 = vmatpush.xpose.msk.msra.mxu2 %vm35_vm0, %v34_v0  ;;  %181 = vmatpush.xpose.msk.msra.mxu3 %vm35_vm0, %v34_v0 }
   0x3   :  { %159 = vmatpush.xpose.msk.msra.mxu0 %vm35_vm0, %v34_v0  ;;  %179 = vmatpush.xpose.msk.msra.mxu1 %vm35_vm0, %v34_v0 }
   0x4   :  { %8 = vsyncpa [#allocation3], 0  ;;  %v32_v2 = vld [vmem:[%s418_s0 + $0x68] sm:$0xff]  ;;  %v31_v3 = vld [vmem:[%s418_s0 + $0x60] sm:$0xff]  ;;  %s254_s4 = smov [#allocation2]   ;;  %s150_s8 = sshll.u32 %s421_s3, 4  ;;  %s151_s8 = int_to_ptr.hbm [resolvable:$true] %s150_s8 }
   0x5   :  { %v30_v4 = vld [vmem:[%s418_s0 + $0x58] sm:$0xff]  ;;  %v29_v5 = vld [vmem:[%s418_s0 + $0x50] sm:$0xff]  ;;  %v28_v6 = vld [vmem:[%s418_s0 + $0x48] sm:$0xff]  ;;  %s148_s5 = sshll.u32 %s254_s4, 4  ;;  %s149_s5 = int_to_ptr.vmem [resolvable:$true] %s148_s5 }
   0x6   :  { %183 = vmatpush.xpose.msk.msra.mxu2 %vm35_vm0, %v33_v1  ;;  %184 = vmatpush.xpose.msk.msra.mxu3 %vm35_vm0, %v33_v1  ;;  %v27_v7 = vld [vmem:[%s418_s0 + $0x40] sm:$0xff]  ;;  %v26_v8 = vld [vmem:[%s418_s0 + $0x38] sm:$0xff]  ;;  %v25_v9 = vld [vmem:[%s418_s0 + $0x30] sm:$0xff] }
   0x7   :  { %160 = vmatpush.xpose.msk.msra.mxu0 %vm35_vm0, %v33_v1  ;;  %182 = vmatpush.xpose.msk.msra.mxu1 %vm35_vm0, %v33_v1  ;;  %v24_v10 = vld [vmem:[%s418_s0 + $0x28] sm:$0xff]  ;;  %v23_v11 = vld [vmem:[%s418_s0 + $0x20] sm:$0xff]  ;;  %v22_v12 = vld [vmem:[%s418_s0 + $0x18] sm:$0xff] }
   0x8   :  { %v21_v13 = vld [vmem:[%s418_s0 + $0x10] sm:$0xff]  ;;  %v20_v14 = vld [vmem:[%s418_s0 + $0x8] sm:$0xff]  ;;  %v19_v15 = vld [vmem:[%s418_s0] sm:$0xff] }
   0x9   :  { %v17_v16 = vld [vmem:[%s419_s1 + $0x10] sm:$0xff]  ;;  %v18_v17 = vld [vmem:[%s419_s1 + $0x18] sm:$0xff]  ;;  %v15_v18 = vld [vmem:[%s419_s1] sm:$0xff] }
   0xa   :  { %186 = vmatpush.xpose.msk.msra.mxu2 %vm35_vm0, %v32_v2  ;;  %187 = vmatpush.xpose.msk.msra.mxu3 %vm35_vm0, %v32_v2  ;;  %v16_v19 = vld [vmem:[%s419_s1 + $0x8] sm:$0xff]  ;;  %v125_v20 = vld [vmem:[%s420_s2] sm:$0xff]  ;;  %v127_v26 = vld [vmem:[%s420_s2 + $0x10] sm:$0xff] }
   0xb   :  { %161 = vmatpush.xpose.msk.msra.mxu0 %vm35_vm0, %v32_v2  ;;  %185 = vmatpush.xpose.msk.msra.mxu1 %vm35_vm0, %v32_v2  ;;  %v126_v21 = vld [vmem:[%s420_s2 + $0x8] sm:$0xff]  ;;  %v128_v27 = vld [vmem:[%s420_s2 + $0x18] sm:$0xff] }
   0xe   :  { %189 = vmatpush.xpose.msk.msra.mxu2 %vm35_vm0, %v31_v3  ;;  %190 = vmatpush.xpose.msk.msra.mxu3 %vm35_vm0, %v31_v3 }
   0xf   :  { %162 = vmatpush.xpose.msk.msra.mxu0 %vm35_vm0, %v31_v3  ;;  %188 = vmatpush.xpose.msk.msra.mxu1 %vm35_vm0, %v31_v3 }
  0x12   :  { %192 = vmatpush.xpose.msk.msra.mxu2 %vm35_vm0, %v30_v4  ;;  %193 = vmatpush.xpose.msk.msra.mxu3 %vm35_vm0, %v30_v4 }
  0x13   :  { %163 = vmatpush.xpose.msk.msra.mxu0 %vm35_vm0, %v30_v4  ;;  %191 = vmatpush.xpose.msk.msra.mxu1 %vm35_vm0, %v30_v4 }
  0x16   :  { %195 = vmatpush.xpose.msk.msra.mxu2 %vm35_vm0, %v29_v5  ;;  %196 = vmatpush.xpose.msk.msra.mxu3 %vm35_vm0, %v29_v5 }
  0x17   :  { %164 = vmatpush.xpose.msk.msra.mxu0 %vm35_vm0, %v29_v5  ;;  %194 = vmatpush.xpose.msk.msra.mxu1 %vm35_vm0, %v29_v5 }
  0x1a   :  { %198 = vmatpush.xpose.msk.msra.mxu2 %vm35_vm0, %v28_v6  ;;  %199 = vmatpush.xpose.msk.msra.mxu3 %vm35_vm0, %v28_v6 }
  0x1b   :  { %165 = vmatpush.xpose.msk.msra.mxu0 %vm35_vm0, %v28_v6  ;;  %197 = vmatpush.xpose.msk.msra.mxu1 %vm35_vm0, %v28_v6 }
  0x1e   :  { %201 = vmatpush.xpose.msk.msra.mxu2 %vm35_vm0, %v27_v7  ;;  %202 = vmatpush.xpose.msk.msra.mxu3 %vm35_vm0, %v27_v7 }
  0x1f   :  { %166 = vmatpush.xpose.msk.msra.mxu0 %vm35_vm0, %v27_v7  ;;  %200 = vmatpush.xpose.msk.msra.mxu1 %vm35_vm0, %v27_v7 }
  0x22   :  { %204 = vmatpush.xpose.msk.msra.mxu2 %vm35_vm0, %v26_v8  ;;  %205 = vmatpush.xpose.msk.msra.mxu3 %vm35_vm0, %v26_v8 }
  0x23   :  { %167 = vmatpush.xpose.msk.msra.mxu0 %vm35_vm0, %v26_v8  ;;  %203 = vmatpush.xpose.msk.msra.mxu1 %vm35_vm0, %v26_v8 }
  0x26   :  { %207 = vmatpush.xpose.msk.msra.mxu2 %vm35_vm0, %v25_v9  ;;  %208 = vmatpush.xpose.msk.msra.mxu3 %vm35_vm0, %v25_v9 }
  0x27   :  { %168 = vmatpush.xpose.msk.msra.mxu0 %vm35_vm0, %v25_v9  ;;  %206 = vmatpush.xpose.msk.msra.mxu1 %vm35_vm0, %v25_v9 }
  0x2a   :  { %210 = vmatpush.xpose.msk.msra.mxu2 %vm35_vm0, %v24_v10  ;;  %211 = vmatpush.xpose.msk.msra.mxu3 %vm35_vm0, %v24_v10 }
  0x2b   :  { %169 = vmatpush.xpose.msk.msra.mxu0 %vm35_vm0, %v24_v10  ;;  %209 = vmatpush.xpose.msk.msra.mxu1 %vm35_vm0, %v24_v10 }
  0x2e   :  { %213 = vmatpush.xpose.msk.msra.mxu2 %vm35_vm0, %v23_v11  ;;  %214 = vmatpush.xpose.msk.msra.mxu3 %vm35_vm0, %v23_v11 }
  0x2f   :  { %170 = vmatpush.xpose.msk.msra.mxu0 %vm35_vm0, %v23_v11  ;;  %212 = vmatpush.xpose.msk.msra.mxu1 %vm35_vm0, %v23_v11 }
  0x32   :  { %216 = vmatpush.xpose.msk.msra.mxu2 %vm35_vm0, %v22_v12  ;;  %217 = vmatpush.xpose.msk.msra.mxu3 %vm35_vm0, %v22_v12 }
  0x33   :  { %171 = vmatpush.xpose.msk.msra.mxu0 %vm35_vm0, %v22_v12  ;;  %215 = vmatpush.xpose.msk.msra.mxu1 %vm35_vm0, %v22_v12 }
  0x36   :  { %219 = vmatpush.xpose.msk.msra.mxu2 %vm35_vm0, %v21_v13  ;;  %220 = vmatpush.xpose.msk.msra.mxu3 %vm35_vm0, %v21_v13 }
  0x37   :  { %172 = vmatpush.xpose.msk.msra.mxu0 %vm35_vm0, %v21_v13  ;;  %218 = vmatpush.xpose.msk.msra.mxu1 %vm35_vm0, %v21_v13 }
  0x3a   :  { %222 = vmatpush.xpose.msk.msra.mxu2 %vm35_vm0, %v20_v14  ;;  %223 = vmatpush.xpose.msk.msra.mxu3 %vm35_vm0, %v20_v14 }
  0x3b   :  { %173 = vmatpush.xpose.msk.msra.mxu0 %vm35_vm0, %v20_v14  ;;  %221 = vmatpush.xpose.msk.msra.mxu1 %vm35_vm0, %v20_v14 }
  0x3e   :  { %225 = vmatpush.xpose.msk.msra.mxu2 %vm35_vm0, %v19_v15  ;;  %226 = vmatpush.xpose.msk.msra.mxu3 %vm35_vm0, %v19_v15 }
  0x3f   :  { %174 = vmatpush.xpose.msk.msra.mxu0 %vm35_vm0, %v19_v15  ;;  %224 = vmatpush.xpose.msk.msra.mxu1 %vm35_vm0, %v19_v15 }
  0x41   :  { %177 = vmatmul.msk.f32.vlgmr.msra.gmra.mxu2 %vm35_vm0, %v17_v16  ;;  %178 = vmatmul.msk.f32.vlgmr.msra.gmra.mxu3 %vm35_vm0, %v18_v17 }
  0x42   :  { %175 = vmatmul.msk.f32.vlgmr.msra.gmra.mxu0 %vm35_vm0, %v15_v18  ;;  %176 = vmatmul.msk.f32.vlgmr.msra.gmra.mxu1 %vm35_vm0, %v16_v19 }
  0xbf   :  { %v113_v22 = vpop.f32.mrf.mxu0  ;;  %v116_v23 = vpop.f32.mrf.mxu1 }
  0xc0   :  { %v129_v24 = vmul.f32 %v125_v20, %v113_v22  ;;  %v130_v25 = vmul.f32 %v126_v21, %v116_v23 }
  0xc2   :  { %v133_v28 = vadd.f32 %v130_v25, %v129_v24 }
  0xc4   :  { %v119_v29 = vpop.f32.mrf.mxu2  ;;  %v122_v30 = vpop.f32.mrf.mxu3 }
  0xc5   :  { %v131_v31 = vmul.f32 %v127_v26, %v119_v29  ;;  %v132_v32 = vmul.f32 %v128_v27, %v122_v30 }
  0xc7   :  { %v134_v33 = vadd.f32 %v133_v28, %v131_v31 }
  0xc9   :  { %v135_v34 = vadd.f32 %v134_v33, %v132_v32 }
  0xcb   :  { %v136_v35 = vrot.slane %v135_v34, 4 }
  0xcd   :  { %v137_v36 = vadd.f32 %v136_v35, %v135_v34 }
  0xcf   :  { %v138_v37 = vrot.slane %v137_v36, 2 }
  0xd1   :  { %v139_v38 = vadd.f32 %v138_v37, %v137_v36 }
  0xd3   :  { %v140_v39 = vrot.slane %v139_v38, 1 }
  0xd5   :  { %v141_v40 = vadd.f32 %v140_v39, %v139_v38 }
  0xd7   :  { %142 = vst [vmem:[#allocation2] sm:$0x1] %v141_v40 }
  0xd8   :  { %153 = dma.vmem_to_hbm [thread:$0]  %s149_s5, 16, %s151_s8, [#allocation3]  }
  0xd9   :  { %252 = dma.done.wait [#allocation3], 16  }
  0xda   :  { %253 = vsyncadd [#allocation3], 4294967280 }
  0xdb   :  { %158 = vsyncpa [#allocation3], 1 }

</bundles_post_ra>
